<compile_context>
chip_gen: v7x
topology: tpu7x:2x2x1
jax: 0.10.0
libtpu: 0.0.40
codegen_flags: <defaults>
</compile_context>

<pallas_src>
import math
import functools
import jax
import jax.numpy as jnp
from jax.experimental import pallas as pl
from jax.experimental.pallas import tpu as pltpu  # noqa: F401  (TPU backend import)


# ----------------------------------------------------------------------------
# Log-Gabor weight construction (parameter setup, plain JAX — tiny tensors)
# ----------------------------------------------------------------------------
def init_loggabor_params(key, out_channels, in_channels, kernel_size):
    k1, k2, k3 = jax.random.split(key, 3)
    r_freq = jax.random.randint(k1, (out_channels, in_channels), 0, 5)
    freq = (math.pi / 2) * (jnp.float32(math.sqrt(2.0)) ** (-r_freq.astype(jnp.float32)))
    r_theta = jax.random.randint(k2, (out_channels, in_channels), 0, 8)
    theta = (math.pi / 8) * r_theta.astype(jnp.float32)
    sigma = math.pi / freq
    psi = math.pi * jax.random.uniform(k3, (out_channels, in_channels), jnp.float32)
    kh = kw = kernel_size
    x0 = math.ceil(kh / 2)
    y0 = math.ceil(kw / 2)
    lin0 = jnp.linspace(-x0 + 1.0, x0 + 0.0, kh)          # matches torch.linspace
    lin1 = jnp.linspace(-y0 + 1.0, y0 + 0.0, kw)
    y_grid, x_grid = jnp.meshgrid(lin0, lin1, indexing="ij")   # torch.meshgrid default
    return dict(freq=freq, theta=theta, sigma=sigma, psi=psi,
                f0=jnp.float32(1.0), theta0=jnp.float32(1.0),
                x=x_grid.astype(jnp.float32), y=y_grid.astype(jnp.float32))


def loggabor_weight(freq, theta, sigma, psi, f0, theta0, x, y, delta=0.001):
    # returns conv weight (O, I, KH, KW), same math as LogGaborConv2d.calculate_weights
    f = freq[:, :, None, None]
    th = theta[:, :, None, None]
    sg = sigma[:, :, None, None]
    ps = psi[:, :, None, None]
    xg = x[None, None, :, :]
    yg = y[None, None, :, :]
    rotx = xg * jnp.cos(th) + yg * jnp.sin(th)
    roty = -xg * jnp.sin(th) + yg * jnp.cos(th)
    r = jnp.sqrt(rotx ** 2 + roty ** 2 + delta)
    g_radial = jnp.exp(-(((jnp.log(r) - jnp.log(f0)) / (2.0 * jnp.log(sg / f0))) ** 2))
    g_angular = jnp.exp(-((th - theta0) ** 2) / (2.0 * sg ** 2))
    g = g_radial * g_angular
    g = g * jnp.cos(f * r + ps)
    g = g / (2.0 * math.pi * sg ** 2)
    return g.astype(jnp.float32)


# ----------------------------------------------------------------------------
# Single fused Pallas kernel:
#   im2col conv (freq + spatial branches in one matmul) -> 1x1 fusion conv
#   -> BatchNorm2d (training batch stats) -> ReLU -> ChannelAttention gate
# Layout inside the kernel: channels on the sublane axis, N*H*W (or H*W) on
# the 128-lane axis -> dense, unmasked vector loads/stores everywhere.
# ----------------------------------------------------------------------------
def _build_fused_kernel(n_batch, hw):
    def kernel(p_ref, wc_ref, wfu_ref, bfu_ref, g_ref, beta_ref,
               wa1_ref, wa2_ref, wm1_ref, wm2_ref, o_ref):
        # p_ref   : (K*K*3*Cin, N*HW)   im2col patches (lane axis = N*HW, dense)
        # wc_ref  : (2*Cout, K*K*3*Cin) combined freq+spatial LogGabor weights
        # wfu_ref : (Cout, 2*Cout)      1x1 fusion conv weight
        # bfu/g/beta: (Cout, 1)         fusion bias, BN gamma, BN beta
        # wa1/wm1 : (Cr, Cout) ; wa2/wm2: (Cout, Cr)   attention MLP weights
        # o_ref   : (N, Cout, HW)
        patches = p_ref[...]

        # Both 3x3 conv branches as ONE im2col matmul -> (2*Cout, N*HW)
        conv = jnp.dot(wc_ref[...], patches, preferred_element_type=jnp.float32)

        # 1x1 fusion conv (+ bias) -> (Cout, N*HW)
        z = jnp.dot(wfu_ref[...], conv, preferred_element_type=jnp.float32) + bfu_ref[...]

        # BatchNorm2d, training-mode batch statistics (biased variance, eps=1e-5)
        mean = jnp.mean(z, axis=1, keepdims=True)
        var = jnp.mean((z - mean) ** 2, axis=1, keepdims=True)
        y = jnp.maximum(
            (z - mean) * jax.lax.rsqrt(var + 1e-5) * g_ref[...] + beta_ref[...], 0.0)

        # ChannelAttention per batch sample (N is tiny -> static unroll; all
        # slices are at lane offsets that are multiples of 128).
        for n in range(n_batch):
            yn = y[:, n * hw:(n + 1) * hw]                 # (Cout, HW)
            avg = jnp.mean(yn, axis=1, keepdims=True)      # AdaptiveAvgPool2d(1)
            mx = jnp.max(yn, axis=1, keepdims=True)        # AdaptiveMaxPool2d(1)
            a = jnp.dot(
                wa2_ref[...],
                jnp.maximum(jnp.dot(wa1_ref[...], avg,
                                    preferred_element_type=jnp.float32), 0.0),
                preferred_element_type=jnp.float32)
            m = jnp.dot(
                wm2_ref[...],
                jnp.maximum(jnp.dot(wm1_ref[...], mx,
                                    preferred_element_type=jnp.float32), 0.0),
                preferred_element_type=jnp.float32)
            gate = jax.nn.sigmoid(a + m)                   # (Cout, 1)
            o_ref[n] = (yn * gate).astype(o_ref.dtype)     # dense 256-lane store
    return kernel


# ----------------------------------------------------------------------------
# Full forward pass of EqualKernelDualDomainAttenLogGabConv2d
# ----------------------------------------------------------------------------
def forward(x, p_freq, p_spat, w_fusion, b_fusion, gamma, beta,
            wa1, wa2, wm1, wm2, padding):
    N, Cin, H, W = x.shape
    Cout = w_fusion.shape[0]
    K = p_spat["x"].shape[0]
    C3 = 3 * Cin

    # TODO(synk): fft2/fftshift/abs/angle have no Pallas primitive; they stay in plain JAX.
    xf = jnp.fft.fftshift(jnp.fft.fft2(x))        # fftshift over ALL dims (torch default)
    # Combined input: [ |FFT| (Cin), angle(FFT) (Cin), spatial x (Cin) ]
    x_all = jnp.concatenate([jnp.abs(xf), jnp.angle(xf), x], axis=1)   # (N, 3Cin, H, W)

    # LogGabor conv weights (tiny parameter math, plain JAX)
    w_freq = loggabor_weight(**p_freq)            # (Cout, 2Cin, K, K)
    w_spat = loggabor_weight(**p_spat)            # (Cout,  Cin, K, K)

    # One block-structured im2col weight for BOTH branches:
    #   rows [0:Cout]      -> freq-branch output channels (consume x_all chans [0:2Cin])
    #   rows [Cout:2Cout]  -> spatial-branch output channels (consume chans [2Cin:3Cin])
    # column order = (kh, kw, channel-of-x_all), matching the patch layout below.
    wf_t = jnp.pad(jnp.transpose(w_freq, (0, 2, 3, 1)),
                   ((0, 0), (0, 0), (0, 0), (0, Cin)))
    ws_t = jnp.pad(jnp.transpose(w_spat, (0, 2, 3, 1)),
                   ((0, 0), (0, 0), (0, 0), (2 * Cin, 0)))
    w_comb = jnp.concatenate([wf_t.reshape(Cout, K * K * C3),
                              ws_t.reshape(Cout, K * K * C3)], axis=0)   # (2Cout, K*K*C3)

    # im2col patches (one-time layout plumbing in XLA; all math is in the kernel).
    Ho = H + 2 * padding - K + 1
    Wo = W + 2 * padding - K + 1
    HW = Ho * Wo
    xp = jnp.pad(x_all, ((0, 0), (0, 0), (padding, padding), (padding, padding)))
    taps = [xp[:, :, kh:kh + Ho, kw:kw + Wo] for kh in range(K) for kw in range(K)]
    patches = jnp.concatenate(taps, axis=1).reshape(N, K * K * C3, HW)
    patches = jnp.transpose(patches, (1, 0, 2)).reshape(K * K * C3, N * HW)

    out = pl.pallas_call(
        _build_fused_kernel(N, HW),
        out_shape=jax.ShapeDtypeStruct((N, Cout, HW), jnp.float32),
    )(patches, w_comb, w_fusion,
      b_fusion.reshape(Cout, 1), gamma.reshape(Cout, 1), beta.reshape(Cout, 1),
      wa1, wa2, wm1, wm2)

    # (N, Cout, H*W) is already NCHW-flat: only a free reshape at the boundary.
    return out.reshape(N, Cout, Ho, Wo)


if __name__ == "__main__":
    key = jax.random.PRNGKey(0)
    N, Cin, H, W = 2, 4, 16, 16
    Cout, K, padding = 8, 3, 1

    keys = jax.random.split(key, 9)
    x = jax.random.normal(keys[0], (N, Cin, H, W), jnp.float32)

    # Log-Gabor parameters (deterministic synthetic init)
    p_freq = init_loggabor_params(keys[1], Cout, Cin * 2, K)
    p_spat = init_loggabor_params(keys[2], Cout, Cin, K)

    # fusion: Conv2d(2*Cout, Cout, 1) + BatchNorm2d(Cout)
    w_fusion = 0.1 * jax.random.normal(keys[3], (Cout, Cout * 2), jnp.float32)
    b_fusion = 0.1 * jax.random.normal(keys[4], (Cout,), jnp.float32)
    gamma = jnp.ones((Cout,), jnp.float32)
    beta = jnp.zeros((Cout,), jnp.float32)

    # ChannelAttention (reduction_ratio=2): two independent 1x1-conv MLPs (no bias)
    Cr = Cout // 2
    wa1 = 0.1 * jax.random.normal(keys[5], (Cr, Cout), jnp.float32)
    wa2 = 0.1 * jax.random.normal(keys[6], (Cout, Cr), jnp.float32)
    wm1 = 0.1 * jax.random.normal(keys[7], (Cr, Cout), jnp.float32)
    wm2 = 0.1 * jax.random.normal(keys[8], (Cout, Cr), jnp.float32)

    fwd = jax.jit(functools.partial(forward, padding=padding))
    out = fwd(x, p_freq, p_spat, w_fusion, b_fusion, gamma, beta,
              wa1, wa2, wm1, wm2)
    out = jax.block_until_ready(out)
    assert out.shape == (N, Cout, H, W) and out.dtype == jnp.float32
    print("KERNEL_OK")
</pallas_src>

<mosaic_0001>
module attributes {stable_mosaic.version = 11 : i64} {
  func.func @kernel(%arg0: memref<108x512xf32, #tpu.memory_space<vmem>>, %arg1: memref<16x108xf32, #tpu.memory_space<vmem>>, %arg2: memref<8x16xf32, #tpu.memory_space<vmem>>, %arg3: memref<8x1xf32, #tpu.memory_space<vmem>>, %arg4: memref<8x1xf32, #tpu.memory_space<vmem>>, %arg5: memref<8x1xf32, #tpu.memory_space<vmem>>, %arg6: memref<4x8xf32, #tpu.memory_space<vmem>>, %arg7: memref<8x4xf32, #tpu.memory_space<vmem>>, %arg8: memref<4x8xf32, #tpu.memory_space<vmem>>, %arg9: memref<8x4xf32, #tpu.memory_space<vmem>>, %arg10: memref<2x8x256xf32, #tpu.memory_space<vmem>>) attributes {dimension_semantics = [], scalar_prefetch = 0 : i64, scratch_operands = 0 : i64, tpu.core_type = #tpu.core_type<tc>} {
    %c0 = arith.constant 0 : index
    %c0_0 = arith.constant 0 : index
    %0 = vector.load %arg0[%c0, %c0_0] : memref<108x512xf32, #tpu.memory_space<vmem>>, vector<108x512xf32>
    %c0_1 = arith.constant 0 : index
    %c0_2 = arith.constant 0 : index
    %1 = vector.load %arg1[%c0_1, %c0_2] : memref<16x108xf32, #tpu.memory_space<vmem>>, vector<16x108xf32>
    %cst = arith.constant dense<0.000000e+00> : vector<16x512xf32>
    %2 = tpu.matmul %1, %0, %cst {dimension_numbers = #tpu.dot_dimension_numbers<[1], [0], [0], [1], [0, 0, 1, 1], [], []>} : vector<16x108xf32>, vector<108x512xf32>, vector<16x512xf32> -> vector<16x512xf32>
    %c0_3 = arith.constant 0 : index
    %c0_4 = arith.constant 0 : index
    %3 = vector.load %arg2[%c0_3, %c0_4] : memref<8x16xf32, #tpu.memory_space<vmem>>, vector<8x16xf32>
    %cst_5 = arith.constant dense<0.000000e+00> : vector<8x512xf32>
    %4 = tpu.matmul %3, %2, %cst_5 {dimension_numbers = #tpu.dot_dimension_numbers<[1], [0], [0], [1], [0, 0, 1, 1], [], []>} : vector<8x16xf32>, vector<16x512xf32>, vector<8x512xf32> -> vector<8x512xf32>
    %c0_6 = arith.constant 0 : index
    %c0_7 = arith.constant 0 : index
    %5 = vector.load %arg3[%c0_6, %c0_7] : memref<8x1xf32, #tpu.memory_space<vmem>>, vector<8x1xf32>
    %6 = vector.broadcast %5 : vector<8x1xf32> to vector<8x512xf32>
    %7 = arith.addf %4, %6 : vector<8x512xf32>
    %cst_8 = arith.constant dense<0.000000e+00> : vector<8xf32>
    %8 = vector.multi_reduction <add>, %7, %cst_8 [1] : vector<8x512xf32> to vector<8xf32>
    %9 = vector.shape_cast %8 : vector<8xf32> to vector<8x1xf32>
    %cst_9 = arith.constant 5.120000e+02 : f32
    %10 = vector.broadcast %cst_9 : f32 to vector<8x1xf32>
    %11 = arith.divf %9, %10 : vector<8x1xf32>
    %12 = vector.broadcast %11 : vector<8x1xf32> to vector<8x512xf32>
    %13 = arith.subf %7, %12 : vector<8x512xf32>
    %14 = arith.mulf %13, %13 : vector<8x512xf32>
    %cst_10 = arith.constant dense<0.000000e+00> : vector<8xf32>
    %15 = vector.multi_reduction <add>, %14, %cst_10 [1] : vector<8x512xf32> to vector<8xf32>
    %16 = vector.shape_cast %15 : vector<8xf32> to vector<8x1xf32>
    %cst_11 = arith.constant 5.120000e+02 : f32
    %17 = vector.broadcast %cst_11 : f32 to vector<8x1xf32>
    %18 = arith.divf %16, %17 : vector<8x1xf32>
    %19 = vector.broadcast %11 : vector<8x1xf32> to vector<8x512xf32>
    %20 = arith.subf %7, %19 : vector<8x512xf32>
    %cst_12 = arith.constant 9.99999974E-6 : f32
    %21 = vector.broadcast %cst_12 : f32 to vector<8x1xf32>
    %22 = arith.addf %18, %21 : vector<8x1xf32>
    %23 = math.rsqrt %22 : vector<8x1xf32>
    %24 = vector.broadcast %23 : vector<8x1xf32> to vector<8x512xf32>
    %25 = arith.mulf %20, %24 : vector<8x512xf32>
    %c0_13 = arith.constant 0 : index
    %c0_14 = arith.constant 0 : index
    %26 = vector.load %arg4[%c0_13, %c0_14] : memref<8x1xf32, #tpu.memory_space<vmem>>, vector<8x1xf32>
    %27 = vector.broadcast %26 : vector<8x1xf32> to vector<8x512xf32>
    %28 = arith.mulf %25, %27 : vector<8x512xf32>
    %c0_15 = arith.constant 0 : index
    %c0_16 = arith.constant 0 : index
    %29 = vector.load %arg5[%c0_15, %c0_16] : memref<8x1xf32, #tpu.memory_space<vmem>>, vector<8x1xf32>
    %30 = vector.broadcast %29 : vector<8x1xf32> to vector<8x512xf32>
    %31 = arith.addf %28, %30 : vector<8x512xf32>
    %cst_17 = arith.constant 0.000000e+00 : f32
    %32 = vector.broadcast %cst_17 : f32 to vector<8x512xf32>
    %33 = arith.maximumf %31, %32 : vector<8x512xf32>
    %34 = vector.extract_strided_slice %33 {offsets = [0, 0], sizes = [8, 256], strides = [1, 1]} : vector<8x512xf32> to vector<8x256xf32>
    %cst_18 = arith.constant dense<0.000000e+00> : vector<8xf32>
    %35 = vector.multi_reduction <add>, %34, %cst_18 [1] : vector<8x256xf32> to vector<8xf32>
    %36 = vector.shape_cast %35 : vector<8xf32> to vector<8x1xf32>
    %cst_19 = arith.constant 2.560000e+02 : f32
    %37 = vector.broadcast %cst_19 : f32 to vector<8x1xf32>
    %38 = arith.divf %36, %37 : vector<8x1xf32>
    %cst_20 = arith.constant dense<0xFF800000> : vector<8xf32>
    %39 = vector.multi_reduction <maximumf>, %34, %cst_20 [1] : vector<8x256xf32> to vector<8xf32>
    %40 = vector.shape_cast %39 : vector<8xf32> to vector<8x1xf32>
    %c0_21 = arith.constant 0 : index
    %c0_22 = arith.constant 0 : index
    %41 = vector.load %arg7[%c0_21, %c0_22] : memref<8x4xf32, #tpu.memory_space<vmem>>, vector<8x4xf32>
    %c0_23 = arith.constant 0 : index
    %c0_24 = arith.constant 0 : index
    %42 = vector.load %arg6[%c0_23, %c0_24] : memref<4x8xf32, #tpu.memory_space<vmem>>, vector<4x8xf32>
    %cst_25 = arith.constant dense<0.000000e+00> : vector<4x1xf32>
    %43 = tpu.matmul %42, %38, %cst_25 {dimension_numbers = #tpu.dot_dimension_numbers<[1], [0], [0], [1], [0, 0, 1, 1], [], []>} : vector<4x8xf32>, vector<8x1xf32>, vector<4x1xf32> -> vector<4x1xf32>
    %cst_26 = arith.constant 0.000000e+00 : f32
    %44 = vector.broadcast %cst_26 : f32 to vector<4x1xf32>
    %45 = arith.maximumf %43, %44 : vector<4x1xf32>
    %cst_27 = arith.constant dense<0.000000e+00> : vector<8x1xf32>
    %46 = tpu.matmul %41, %45, %cst_27 {dimension_numbers = #tpu.dot_dimension_numbers<[1], [0], [0], [1], [0, 0, 1, 1], [], []>} : vector<8x4xf32>, vector<4x1xf32>, vector<8x1xf32> -> vector<8x1xf32>
    %c0_28 = arith.constant 0 : index
    %c0_29 = arith.constant 0 : index
    %47 = vector.load %arg9[%c0_28, %c0_29] : memref<8x4xf32, #tpu.memory_space<vmem>>, vector<8x4xf32>
    %c0_30 = arith.constant 0 : index
    %c0_31 = arith.constant 0 : index
    %48 = vector.load %arg8[%c0_30, %c0_31] : memref<4x8xf32, #tpu.memory_space<vmem>>, vector<4x8xf32>
    %cst_32 = arith.constant dense<0.000000e+00> : vector<4x1xf32>
    %49 = tpu.matmul %48, %40, %cst_32 {dimension_numbers = #tpu.dot_dimension_numbers<[1], [0], [0], [1], [0, 0, 1, 1], [], []>} : vector<4x8xf32>, vector<8x1xf32>, vector<4x1xf32> -> vector<4x1xf32>
    %cst_33 = arith.constant 0.000000e+00 : f32
    %50 = vector.broadcast %cst_33 : f32 to vector<4x1xf32>
    %51 = arith.maximumf %49, %50 : vector<4x1xf32>
    %cst_34 = arith.constant dense<0.000000e+00> : vector<8x1xf32>
    %52 = tpu.matmul %47, %51, %cst_34 {dimension_numbers = #tpu.dot_dimension_numbers<[1], [0], [0], [1], [0, 0, 1, 1], [], []>} : vector<8x4xf32>, vector<4x1xf32>, vector<8x1xf32> -> vector<8x1xf32>
    %53 = arith.addf %46, %52 : vector<8x1xf32>
    %54 = arith.negf %53 : vector<8x1xf32>
    %55 = math.exp %54 : vector<8x1xf32>
    %cst_35 = arith.constant 1.000000e+00 : f32
    %56 = vector.broadcast %cst_35 : f32 to vector<8x1xf32>
    %57 = arith.addf %56, %55 : vector<8x1xf32>
    %58 = arith.divf %56, %57 : vector<8x1xf32>
    %59 = vector.broadcast %58 : vector<8x1xf32> to vector<8x256xf32>
    %60 = arith.mulf %34, %59 : vector<8x256xf32>
    %c0_36 = arith.constant 0 : index
    %c0_37 = arith.constant 0 : index
    %c0_38 = arith.constant 0 : index
    %61 = vector.load %arg10[%c0_36, %c0_37, %c0_38] : memref<2x8x256xf32, #tpu.memory_space<vmem>>, vector<1x8x256xf32>
    %62 = vector.shape_cast %61 : vector<1x8x256xf32> to vector<8x256xf32>
    %63 = vector.shape_cast %60 : vector<8x256xf32> to vector<1x8x256xf32>
    tpu.vector_store %arg10[%c0_36, %c0_37, %c0_38], %63 {strides = array<i32>} : memref<2x8x256xf32, #tpu.memory_space<vmem>>, vector<1x8x256xf32>,
    %64 = vector.extract_strided_slice %33 {offsets = [0, 256], sizes = [8, 256], strides = [1, 1]} : vector<8x512xf32> to vector<8x256xf32>
    %cst_39 = arith.constant dense<0.000000e+00> : vector<8xf32>
    %65 = vector.multi_reduction <add>, %64, %cst_39 [1] : vector<8x256xf32> to vector<8xf32>
    %66 = vector.shape_cast %65 : vector<8xf32> to vector<8x1xf32>
    %cst_40 = arith.constant 2.560000e+02 : f32
    %67 = vector.broadcast %cst_40 : f32 to vector<8x1xf32>
    %68 = arith.divf %66, %67 : vector<8x1xf32>
    %cst_41 = arith.constant dense<0xFF800000> : vector<8xf32>
    %69 = vector.multi_reduction <maximumf>, %64, %cst_41 [1] : vector<8x256xf32> to vector<8xf32>
    %70 = vector.shape_cast %69 : vector<8xf32> to vector<8x1xf32>
    %c0_42 = arith.constant 0 : index
    %c0_43 = arith.constant 0 : index
    %71 = vector.load %arg7[%c0_42, %c0_43] : memref<8x4xf32, #tpu.memory_space<vmem>>, vector<8x4xf32>
    %c0_44 = arith.constant 0 : index
    %c0_45 = arith.constant 0 : index
    %72 = vector.load %arg6[%c0_44, %c0_45] : memref<4x8xf32, #tpu.memory_space<vmem>>, vector<4x8xf32>
    %cst_46 = arith.constant dense<0.000000e+00> : vector<4x1xf32>
    %73 = tpu.matmul %72, %68, %cst_46 {dimension_numbers = #tpu.dot_dimension_numbers<[1], [0], [0], [1], [0, 0, 1, 1], [], []>} : vector<4x8xf32>, vector<8x1xf32>, vector<4x1xf32> -> vector<4x1xf32>
    %cst_47 = arith.constant 0.000000e+00 : f32
    %74 = vector.broadcast %cst_47 : f32 to vector<4x1xf32>
    %75 = arith.maximumf %73, %74 : vector<4x1xf32>
    %cst_48 = arith.constant dense<0.000000e+00> : vector<8x1xf32>
    %76 = tpu.matmul %71, %75, %cst_48 {dimension_numbers = #tpu.dot_dimension_numbers<[1], [0], [0], [1], [0, 0, 1, 1], [], []>} : vector<8x4xf32>, vector<4x1xf32>, vector<8x1xf32> -> vector<8x1xf32>
    %c0_49 = arith.constant 0 : index
    %c0_50 = arith.constant 0 : index
    %77 = vector.load %arg9[%c0_49, %c0_50] : memref<8x4xf32, #tpu.memory_space<vmem>>, vector<8x4xf32>
    %c0_51 = arith.constant 0 : index
    %c0_52 = arith.constant 0 : index
    %78 = vector.load %arg8[%c0_51, %c0_52] : memref<4x8xf32, #tpu.memory_space<vmem>>, vector<4x8xf32>
    %cst_53 = arith.constant dense<0.000000e+00> : vector<4x1xf32>
    %79 = tpu.matmul %78, %70, %cst_53 {dimension_numbers = #tpu.dot_dimension_numbers<[1], [0], [0], [1], [0, 0, 1, 1], [], []>} : vector<4x8xf32>, vector<8x1xf32>, vector<4x1xf32> -> vector<4x1xf32>
    %cst_54 = arith.constant 0.000000e+00 : f32
    %80 = vector.broadcast %cst_54 : f32 to vector<4x1xf32>
    %81 = arith.maximumf %79, %80 : vector<4x1xf32>
    %cst_55 = arith.constant dense<0.000000e+00> : vector<8x1xf32>
    %82 = tpu.matmul %77, %81, %cst_55 {dimension_numbers = #tpu.dot_dimension_numbers<[1], [0], [0], [1], [0, 0, 1, 1], [], []>} : vector<8x4xf32>, vector<4x1xf32>, vector<8x1xf32> -> vector<8x1xf32>
    %83 = arith.addf %76, %82 : vector<8x1xf32>
    %84 = arith.negf %83 : vector<8x1xf32>
    %85 = math.exp %84 : vector<8x1xf32>
    %cst_56 = arith.constant 1.000000e+00 : f32
    %86 = vector.broadcast %cst_56 : f32 to vector<8x1xf32>
    %87 = arith.addf %86, %85 : vector<8x1xf32>
    %88 = arith.divf %86, %87 : vector<8x1xf32>
    %89 = vector.broadcast %88 : vector<8x1xf32> to vector<8x256xf32>
    %90 = arith.mulf %64, %89 : vector<8x256xf32>
    %c1 = arith.constant 1 : index
    %c0_57 = arith.constant 0 : index
    %c0_58 = arith.constant 0 : index
    %91 = vector.load %arg10[%c1, %c0_57, %c0_58] : memref<2x8x256xf32, #tpu.memory_space<vmem>>, vector<1x8x256xf32>
    %92 = vector.shape_cast %91 : vector<1x8x256xf32> to vector<8x256xf32>
    %93 = vector.shape_cast %90 : vector<8x256xf32> to vector<1x8x256xf32>
    tpu.vector_store %arg10[%c1, %c0_57, %c0_58], %93 {strides = array<i32>} : memref<2x8x256xf32, #tpu.memory_space<vmem>>, vector<1x8x256xf32>,
    return
  }
}

</mosaic_0001>

<bundles_post_ra>
// kernel: neg.0
= control target key start
LH: loop header
LB: loop body
LE: loop exit
PB: predicated region body
PF: predicated region fallthrough
CT: control target
= control target key end

     0   :  { %s24_s0 = inlined_call_operand.vmem [shape: f32[3,3], index: 0, kind: input, shape index: {}]   ;;  %s25_s1 = inlined_call_operand.vmem [shape: f32[3,3], index: 1, kind: output, shape index: {}]  }
   0x1   :  { %v2_v0 = vld [vmem:[%s24_s0] sm:$0x7] }
   0x2   :  { %v5_v1 = vxor.u32 2147483648, %v2_v0 }
   0x4   :  { %7 = vst [vmem:[%s25_s1] sm:$0xf] %v5_v1 }

// kernel: forward.1
= control target key start
LH: loop header
LB: loop body
LE: loop exit
PB: predicated region body
PF: predicated region fallthrough
CT: control target
= control target key end

     0   :  { %v1301_v3 = vmov 0.0   ;;  %vm100_vm0 = vcmask 1043456   ;;  %vm1302_vm1 = vmmov 1   ;;  %vm93_vm3 = vcmask 883712   ;;  %s1639_s0 = inlined_call_operand.vmem [shape: f32[108,512], index: 0, kind: input, shape index: {}]   ;;  %s1640_s1 = inlined_call_operand.vmem [shape: f32[16,108], index: 1, kind: input, shape index: {}]   ;;  %s1641_s3 = inlined_call_operand.vmem [shape: f32[8,1], index: 3, kind: input, shape index: {}]   ;;  %s1642_s2 = inlined_call_operand.vmem [shape: f32[8,16], index: 2, kind: input, shape index: {}]   ;;  %s1643_s4 = inlined_call_operand.vmem [shape: f32[8,1], index: 4, kind: input, shape index: {}]   ;;  %s1644_s5 = inlined_call_operand.vmem [shape: f32[8,1], index: 5, kind: input, shape index: {}]   ;;  %s1645_s8 = inlined_call_operand.vmem [shape: f32[4,8], index: 8, kind: input, shape index: {}]   ;;  %s1646_s6 = inlined_call_operand.vmem [shape: f32[4,8], index: 6, kind: input, shape index: {}]   ;;  %s1647_s9 = inlined_call_operand.vmem [shape: f32[8,4], index: 9, kind: input, shape index: {}]   ;;  %s1648_s7 = inlined_call_operand.vmem [shape: f32[8,4], index: 7, kind: input, shape index: {}]   ;;  %s1649_s10 = inlined_call_operand.vmem [shape: f32[2,8,256], index: 10, kind: output, shape index: {}]  }
   0x1   :  { %v36_v0 = vld [vmem:[%s1639_s0 + $0x8] sm:$0xff]  ;;  %v35_v2 = vld [vmem:[%s1639_s0] sm:$0xff]  ;;  %177 = vmatprep.mubr.f32.mxu0 %v1301_v3  ;;  %254 = vmatprep.mubr.f32.mxu1 %v1301_v3  ;;  %v38_v6 = vld [vmem:[%s1639_s0 + $0x18] sm:$0xff]  ;;  %vm274_vm4 = vcmask 130048   ;;  %vm1304_vm5 = vmmov 0   ;;  %vm481_vm6 = vcmask 64512  }
   0x2   :  { %v40_v1 = vld [vmem:[%s1639_s0 + $0x28] sm:$0xff]  ;;  %v39_v5 = vld [vmem:[%s1639_s0 + $0x20] sm:$0xff]  ;;  %v42_v7 = vld [vmem:[%s1639_s0 + $0x38] sm:$0xff]  ;;  %vm632_vm7 = vcmask 31744  }
   0x3   :  { %v1213_v4 = vpack.c.bf16 %v40_v1, %v36_v0  ;;  %v1215_v8 = vpack.c.bf16 %v39_v5, %v35_v2  ;;  %v1243_v9 = vpack.c.bf16 %v42_v7, %v38_v6  ;;  %v37_v10 = vld [vmem:[%s1639_s0 + $0x10] sm:$0xff]  ;;  %v44_v12 = vld [vmem:[%s1639_s0 + $0x48] sm:$0xff]  ;;  %v43_v15 = vld [vmem:[%s1639_s0 + $0x40] sm:$0xff] }
   0x4   :  { %v41_v11 = vld [vmem:[%s1639_s0 + $0x30] sm:$0xff]  ;;  %v48_v14 = vld [vmem:[%s1639_s0 + $0x68] sm:$0xff]  ;;  %v47_v16 = vld [vmem:[%s1639_s0 + $0x60] sm:$0xff] }
   0x5   :  { %1214 = vmatprep.subr.bf16.mxu0 %v1213_v4  ;;  %v1245_v13 = vpack.c.bf16 %v41_v11, %v37_v10  ;;  %1244 = vmatprep.subr.bf16.mxu1 %v1243_v9  ;;  %v1217_v17 = vpack.c.bf16 %v48_v14, %v44_v12  ;;  %v1219_v18 = vpack.c.bf16 %v47_v16, %v43_v15  ;;  %v46_v19 = vld [vmem:[%s1639_s0 + $0x58] sm:$0xff]  ;;  %v45_v21 = vld [vmem:[%s1639_s0 + $0x50] sm:$0xff]  ;;  %v52_v24 = vld [vmem:[%s1639_s0 + $0x88] sm:$0xff] }
   0x6   :  { %1216 = vmatpush1.bf16.msra.mxu0 %v1215_v8  ;;  %v50_v20 = vld [vmem:[%s1639_s0 + $0x78] sm:$0xff]  ;;  %v49_v23 = vld [vmem:[%s1639_s0 + $0x70] sm:$0xff]  ;;  %v56_v25 = vld [vmem:[%s1639_s0 + $0xa8] sm:$0xff] }
   0x7   :  { %1246 = vmatpush1.bf16.msra.mxu1 %v1245_v13  ;;  %v1247_v22 = vpack.c.bf16 %v50_v20, %v46_v19  ;;  %1218 = vmatprep.subr.bf16.mxu0 %v1217_v17  ;;  %v1249_v26 = vpack.c.bf16 %v49_v23, %v45_v21  ;;  %v1221_v27 = vpack.c.bf16 %v56_v25, %v52_v24  ;;  %v51_v28 = vld [vmem:[%s1639_s0 + $0x80] sm:$0xff]  ;;  %v54_v30 = vld [vmem:[%s1639_s0 + $0x98] sm:$0xff]  ;;  %v53_v32 = vld [vmem:[%s1639_s0 + $0x90] sm:$0xff]  ;;  %v1303_v24 = vmov 0  }
   0x8   :  { %v55_v29 = vld [vmem:[%s1639_s0 + $0xa0] sm:$0xff]  ;;  %v58_v31 = vld [vmem:[%s1639_s0 + $0xb8] sm:$0xff]  ;;  %v57_v33 = vld [vmem:[%s1639_s0 + $0xb0] sm:$0xff]  ;;  %1289 = vset.pattern.permute.xlu0 %v1303_v24  ;;  %1290 = vset.pattern.permute.xlu1 %v1303_v24 }
   0x9   :  { %1248 = vmatprep.subr.bf16.mxu1 %v1247_v22  ;;  %v1223_v34 = vpack.c.bf16 %v55_v29, %v51_v28  ;;  %v1251_v35 = vpack.c.bf16 %v58_v31, %v54_v30  ;;  %v60_v36 = vld [vmem:[%s1639_s0 + $0xc8] sm:$0xff]  ;;  %v59_v38 = vld [vmem:[%s1639_s0 + $0xc0] sm:$0xff]  ;;  %v1253_v39 = vpack.c.bf16 %v57_v33, %v53_v32  ;;  %v62_v42 = vld [vmem:[%s1639_s0 + $0xd8] sm:$0xff] }
   0xa   :  { %1220 = vmatpush1.bf16.msra.mxu0 %v1219_v18  ;;  %v64_v37 = vld [vmem:[%s1639_s0 + $0xe8] sm:$0xff]  ;;  %v63_v41 = vld [vmem:[%s1639_s0 + $0xe0] sm:$0xff]  ;;  %v66_v43 = vld [vmem:[%s1639_s0 + $0xf8] sm:$0xff] }
   0xb   :  { %1250 = vmatpush1.bf16.msra.mxu1 %v1249_v26  ;;  %1222 = vmatprep.subr.bf16.mxu0 %v1221_v27  ;;  %v1225_v40 = vpack.c.bf16 %v64_v37, %v60_v36  ;;  %v1255_v44 = vpack.c.bf16 %v66_v43, %v62_v42  ;;  %v61_v45 = vld [vmem:[%s1639_s0 + $0xd0] sm:$0xff]  ;;  %v68_v47 = vld [vmem:[%s1639_s0 + $0x108] sm:$0xff]  ;;  %v1227_v49 = vpack.c.bf16 %v63_v41, %v59_v38  ;;  %v70_v50 = vld [vmem:[%s1639_s0 + $0x118] sm:$0xff] }
   0xc   :  { %1252 = vmatprep.subr.bf16.mxu1 %v1251_v35  ;;  %v65_v46 = vld [vmem:[%s1639_s0 + $0xf0] sm:$0xff]  ;;  %v72_v48 = vld [vmem:[%s1639_s0 + $0x128] sm:$0xff]  ;;  %v74_v51 = vld [vmem:[%s1639_s0 + $0x138] sm:$0xff] }
   0xd   :  { %v1257_v52 = vpack.c.bf16 %v65_v46, %v61_v45  ;;  %v1229_v53 = vpack.c.bf16 %v72_v48, %v68_v47  ;;  %v67_v54 = vld [vmem:[%s1639_s0 + $0x100] sm:$0xff]  ;;  %v69_v56 = vld [vmem:[%s1639_s0 + $0x110] sm:$0xff]  ;;  %v1259_v57 = vpack.c.bf16 %v74_v51, %v70_v50  ;;  %v76_v59 = vld [vmem:[%s1639_s0 + $0x148] sm:$0xff] }
   0xe   :  { %1224 = vmatpush1.bf16.msra.mxu0 %v1223_v34  ;;  %v71_v55 = vld [vmem:[%s1639_s0 + $0x120] sm:$0xff]  ;;  %v73_v58 = vld [vmem:[%s1639_s0 + $0x130] sm:$0xff]  ;;  %v80_v60 = vld [vmem:[%s1639_s0 + $0x168] sm:$0xff] }
   0xf   :  { %1254 = vmatpush1.bf16.msra.mxu1 %v1253_v39  ;;  %1226 = vmatprep.subr.bf16.mxu0 %v1225_v40  ;;  %v78_v61 = vld [vmem:[%s1639_s0 + $0x158] sm:$0xff]  ;;  %v1231_v63 = vpack.c.bf16 %v71_v55, %v67_v54  ;;  %v1261_v0 = vpack.c.bf16 %v73_v58, %v69_v56  ;;  %v1233_v1 = vpack.c.bf16 %v80_v60, %v76_v59  ;;  %v75_v2 = vld [vmem:[%s1639_s0 + $0x140] sm:$0xff]  ;;  %v77_v5 = vld [vmem:[%s1639_s0 + $0x150] sm:$0xff] }
  0x10   :  { %1256 = vmatprep.subr.bf16.mxu1 %v1255_v44  ;;  %v82_v62 = vld [vmem:[%s1639_s0 + $0x178] sm:$0xff]  ;;  %v79_v4 = vld [vmem:[%s1639_s0 + $0x160] sm:$0xff]  ;;  %v81_v7 = vld [vmem:[%s1639_s0 + $0x170] sm:$0xff] }
  0x11   :  { %v1263_v6 = vpack.c.bf16 %v82_v62, %v78_v61  ;;  %v84_v8 = vld [vmem:[%s1639_s0 + $0x188] sm:$0xff]  ;;  %v86_v10 = vld [vmem:[%s1639_s0 + $0x198] sm:$0xff]  ;;  %v1235_v12 = vpack.c.bf16 %v79_v4, %v75_v2  ;;  %v1265_v13 = vpack.c.bf16 %v81_v7, %v77_v5  ;;  %v83_v15 = vld [vmem:[%s1639_s0 + $0x180] sm:$0xff] }
  0x12   :  { %1228 = vmatpush1.bf16.msra.mxu0 %v1227_v49  ;;  %v88_v9 = vld [vmem:[%s1639_s0 + $0x1a8] sm:$0xf]  ;;  %v90_v11 = vld [vmem:[%s1639_s0 + $0x1b8] sm:$0xf]  ;;  %v87_v16 = vld [vmem:[%s1639_s0 + $0x1a0] sm:$0xf] }
  0x13   :  { %1258 = vmatpush1.bf16.msra.mxu1 %v1257_v52  ;;  %1230 = vmatprep.subr.bf16.mxu0 %v1229_v53  ;;  %v1237_v14 = vpack.c.bf16 %v88_v9, %v84_v8  ;;  %vm1238_vm2 = vmpackc.low %vm100_vm0, %vm1302_vm1  ;;  %v1267_v17 = vpack.c.bf16 %v90_v11, %v86_v10  ;;  %v85_v18 = vld [vmem:[%s1639_s0 + $0x190] sm:$0xff]  ;;  %v1240_v20 = vpack.c.bf16 %v87_v16, %v83_v15  ;;  %v91_v22 = vld [vmem:[%s1640_s1] sm:$0xff] }
  0x14   :  { %1260 = vmatprep.subr.bf16.mxu1 %v1259_v57  ;;  %v89_v19 = vld [vmem:[%s1639_s0 + $0x1b0] sm:$0xf]  ;;  %v92_v23 = vld [vmem:[%s1640_s1 + $0x8] sm:$0xff]  ;;  %v268_v25 = vld [vmem:[%s1641_s3] sm:$0xff] }
  0x15   :  { %v1270_v21 = vpack.c.bf16 %v89_v19, %v85_v18  ;;  %271 = vperm.xlu0 %1289, %v268_v25   ;;  %v267_v38 = vld [vmem:[%s1642_s2] sm:$0xff] }
  0x16   :  { %1232 = vmatpush1.bf16.msra.mxu0 %v1231_v63  ;;  %v447_v39 = vld [vmem:[%s1643_s4] sm:$0xff] }
  0x17   :  { %1262 = vmatpush1.bf16.msra.mxu1 %v1261_v0  ;;  %1234 = vmatprep.subr.bf16.mxu0 %v1233_v1  ;;  %v457_v1 = vld [vmem:[%s1644_s5] sm:$0xff] }
  0x18   :  { %1264 = vmatprep.subr.bf16.mxu1 %v1263_v6  ;;  %450 = vperm.xlu1 %1290, %v447_v39  }
  0x1a   :  { %1236 = vmatpush1.bf16.msra.mxu0 %v1235_v12 }
  0x1b   :  { %1266 = vmatpush1.bf16.msra.mxu1 %v1265_v13  ;;  %1239 = vmatprep.subr.msk.bf16.mxu0 %vm1238_vm2, %v1237_v14 }
  0x1c   :  { %1269 = vmatprep.subr.msk.bf16.mxu1 %vm1238_vm2, %v1267_v17 }
  0x1e   :  { %1242 = vmatpush1.bf16.msk.msra.mxu0 %vm1238_vm2, %v1240_v20 }
  0x1f   :  { %1272 = vmatpush1.bf16.msk.msra.mxu1 %vm1238_vm2, %v1270_v21  ;;  %1173 = vmatprep.subr.mxu0 %v1301_v3 }
  0x21   :  { %1133 = vmatmul.mubr.msk.f32.vlgmr.msra.gmra.mrb[0].mxu0 %vm93_vm3, %v91_v22 }
  0x22   :  { %1137 = vmatmul.mubr.msk.f32.vlgmr.msra.gmra.mrb[0].mxu1 %vm93_vm3, %v91_v22  ;;  %183 = vmatprep.mubr.f32.mxu0 %v1301_v3 }
  0x23   :  { %260 = vmatprep.mubr.f32.mxu1 %v1301_v3 }
  0x25   :  { %1134 = vmatmul.mubr.msk.f32.gmra.mrb[2].mxu0 %vm93_vm3, %v92_v23 }
  0x26   :  { %1138 = vmatmul.mubr.msk.f32.gmra.mrb[2].mxu1 %vm93_vm3, %v92_v23  ;;  %1175 = vmatprep.mubr.msk.f32.mxu0 %vm1304_vm5, %v1301_v3 }
  0x27   :  { %342 = vmatprep.mubr.f32.mxu1 %v1301_v3 }
  0x94   :  { %v272_v40 = vpop.permute.xlu0 %271 }
  0x97   :  { %v451_v2 = vpop.permute.xlu1 %450 }
  0xf4   :  { %v179_v26 = vpop.f32.mrb[0].mxu0 }
  0xf5   :  { %v181_v27 = vpop.f32.mrb[1].mxu0  ;;  %v256_v28 = vpop.f32.mrb[0].mxu1 }
  0xf6   :  { %v258_v29 = vpop.f32.mrb[1].mxu1 }
  0xf8   :  { %v185_v30 = vpop.f32.mrb[2].mxu0 }
  0xf9   :  { %v1275_v31 = vpack.c.bf16 %v185_v30, %v179_v26  ;;  %v187_v32 = vpop.f32.mrb[3].mxu0  ;;  %v262_v33 = vpop.f32.mrb[2].mxu1 }
  0xfa   :  { %v1273_v34 = vpack.c.bf16 %v187_v32, %v181_v27  ;;  %v1279_v35 = vpack.c.bf16 %v262_v33, %v256_v28  ;;  %v264_v36 = vpop.f32.mrb[3].mxu1  ;;  %v480_v33 = vld [vmem:[%s1646_s6] sm:$0xf] }
  0xfb   :  { %v1277_v37 = vpack.c.bf16 %v264_v36, %v258_v29  ;;  %v557_v29 = vld [vmem:[%s1645_s8] sm:$0xf] }
  0xfc   :  { %1274 = vmatprep.subr.bf16.mxu1 %v1273_v34  ;;  %v808_v36 = vld [vmem:[%s1646_s6] sm:$0xf] }
  0xfd   :  { %1276 = vmatpush1.bf16.msra.mxu1 %v1275_v31 }
  0xfe   :  { %1278 = vmatprep.subr.bf16.mxu1 %v1277_v37 }
 0x100   :  { %1139 = vmatmul.mubr.msk.f32.vlgmr.msra.gmra.mrb[4].mxu1 %vm274_vm4, %v267_v38 }
 0x101   :  { %1280 = vmatpush1.bf16.msra.mxu1 %v1279_v35  ;;  %413 = vmatprep.mubr.f32.mxu1 %v1301_v3 }
 0x102   :  { %1178 = vmatprep.subr.mxu1 %v1301_v3 }
 0x104   :  { %1140 = vmatmul.mubr.msk.f32.vlgmr.msra.gmra.mrb[6].mxu1 %vm274_vm4, %v267_v38  ;;  %v884_v38 = vld [vmem:[%s1645_s8] sm:$0xf] }
 0x105   :  { %1180 = vmatprep.mubr.msk.f32.mxu1 %vm1304_vm5, %v1301_v3 }
 0x1d3   :  { %v344_v41 = vpop.f32.mrb[4].mxu1 }
 0x1d4   :  { %v345_v42 = vadd.f32 %v344_v41, %v272_v40  ;;  %v346_v43 = vpop.f32.mrb[5].mxu1 }
 0x1d5   :  { %v347_v44 = vadd.f32 %v346_v43, %v272_v40 }
 0x1d7   :  { %v420_v45 = vadd.f32 %v347_v44, %v345_v42  ;;  %v415_v46 = vpop.f32.mrb[6].mxu1 }
 0x1d8   :  { %v416_v47 = vadd.f32 %v415_v46, %v272_v40  ;;  %v417_v48 = vpop.f32.mrb[7].mxu1 }
 0x1d9   :  { %v418_v49 = vadd.f32 %v417_v48, %v272_v40  ;;  %v479_v48 = vld [vmem:[%s1648_s7] sm:$0xff] }
 0x1da   :  { %v421_v50 = vadd.f32 %v420_v45, %v416_v47 }
 0x1dc   :  { %v422_v51 = vadd.f32 %v421_v50, %v418_v49 }
 0x1de   :  { %423 = vadd.xlane.f32.xlu0 %v422_v51 }
 0x26b   :  { %v424_v52 = vpop.xlane.xlu0 %423 }
 0x26c   :  { %v426_v53 = vmul.f32 0.001953125, %v424_v52 }
 0x26e   :  { %v427_v54 = vsub.f32 %v345_v42, %v426_v53  ;;  %v428_v55 = vsub.f32 %v347_v44, %v426_v53  ;;  %v429_v56 = vsub.f32 %v416_v47, %v426_v53  ;;  %v430_v57 = vsub.f32 %v418_v49, %v426_v53  ;;  %v556_v42 = vld [vmem:[%s1647_s9] sm:$0xff] }
 0x270   :  { %v431_v58 = vmul.f32 %v427_v54, %v427_v54  ;;  %v432_v59 = vmul.f32 %v428_v55, %v428_v55  ;;  %v433_v60 = vmul.f32 %v429_v56, %v429_v56  ;;  %v434_v62 = vmul.f32 %v430_v57, %v430_v57 }
 0x272   :  { %v435_v61 = vadd.f32 %v432_v59, %v431_v58 }
 0x274   :  { %v436_v63 = vadd.f32 %v435_v61, %v433_v60 }
 0x276   :  { %v437_v0 = vadd.f32 %v436_v63, %v434_v62 }
 0x278   :  { %438 = vadd.xlane.f32.xlu1 %v437_v0 }
 0x289   :  { %460 = vperm.xlu1 %1290, %v457_v1  }
 0x305   :  { %v439_v4 = vpop.xlane.xlu1 %438 }
 0x306   :  { %v440_v5 = vmul.f32 0.001953125, %v439_v4 }
 0x308   :  { %v441_v6 = vadd.f32 1e-05, %v440_v5 }
 0x309   :  { %v461_v16 = vpop.permute.xlu1 %460 }
 0x30a   :  { %1291 = vrsqrt.f32 %v441_v6 }
 0x314   :  { %v1292_v7 = vpop.eup %1291 }
 0x315   :  { %v443_v8 = vmul.f32 %v1292_v7, %v427_v54  ;;  %v444_v9 = vmul.f32 %v1292_v7, %v428_v55  ;;  %v445_v10 = vmul.f32 %v1292_v7, %v429_v56  ;;  %v446_v11 = vmul.f32 %v1292_v7, %v430_v57 }
 0x317   :  { %v453_v12 = vmul.f32 %v451_v2, %v443_v8  ;;  %v454_v13 = vmul.f32 %v451_v2, %v444_v9  ;;  %v455_v14 = vmul.f32 %v451_v2, %v445_v10  ;;  %v456_v15 = vmul.f32 %v451_v2, %v446_v11 }
 0x319   :  { %v463_v17 = vadd.f32 %v461_v16, %v453_v12  ;;  %v464_v18 = vadd.f32 %v461_v16, %v454_v13  ;;  %v465_v19 = vadd.f32 %v461_v16, %v455_v14  ;;  %v466_v20 = vadd.f32 %v461_v16, %v456_v15 }
 0x31b   :  { %v1555_v21 = vmax.f32 %v463_v17, 0.0  ;;  %v1557_v22 = vmax.f32 %v464_v18, 0.0  ;;  %v1563_v25 = vmax.f32 %v465_v19, 0.0  ;;  %v1565_v26 = vmax.f32 %v466_v20, 0.0 }
 0x31d   :  { %v476_v23 = vmax.f32 %v1555_v21, %v1557_v22  ;;  %v471_v24 = vadd.f32 %v1557_v22, %v1555_v21  ;;  %v800_v27 = vadd.f32 %v1565_v26, %v1563_v25  ;;  %v804_v28 = vmax.f32 %v1563_v25, %v1565_v26 }
 0x31f   :  { %477 = vmax.xlane.f32.xlu1 %v476_v23  ;;  %472 = vadd.xlane.f32.xlu0 %v471_v24 }
 0x323   :  { %801 = vadd.xlane.f32.xlu0 %v800_v27 }
 0x327   :  { %805 = vmax.xlane.f32.xlu0 %v804_v28 }
 0x3ac   :  { %v478_v30 = vpop.xlane.xlu1 %477  ;;  %v473_v31 = vpop.xlane.xlu0 %472 }
 0x3ad   :  { %v475_v32 = vmul.f32 0.00390625, %v473_v31  ;;  %1179 = vmatpush3.msra.mxu1 %v478_v30 }
 0x3ae   :  { %1181 = vmatmul.mubr.msk.f32.vlgmr.msra.gmra.mrb[8].mxu1 %vm481_vm6, %v557_v29  ;;  %1193 = vmatprep.subr.mxu1 %v1301_v3 }
 0x3af   :  { %1174 = vmatpush3.msra.mxu0 %v475_v32  ;;  %1195 = vmatprep.mubr.msk.f32.mxu1 %vm1304_vm5, %v1301_v3 }
 0x3b0   :  { %v802_v34 = vpop.xlane.xlu0 %801  ;;  %1176 = vmatmul.mubr.msk.f32.vlgmr.msra.gmra.mrb[4].mxu0 %vm481_vm6, %v480_v33  ;;  %1183 = vmatprep.subr.mxu0 %v1301_v3 }
 0x3b1   :  { %v803_v35 = vmul.f32 0.00390625, %v802_v34  ;;  %1185 = vmatprep.mubr.msk.f32.mxu0 %vm1304_vm5, %v1301_v3 }
 0x3b3   :  { %1194 = vmatpush3.msra.mxu1 %v803_v35 }
 0x3b4   :  { %1198 = vmatprep.subr.mxu1 %v1301_v3  ;;  %v806_v37 = vpop.xlane.xlu0 %805  ;;  %1196 = vmatmul.mubr.msk.f32.vlgmr.msra.gmra.mrb[10].mxu1 %vm481_vm6, %v808_v36 }
 0x3b5   :  { %1199 = vmatpush3.msra.mxu1 %v806_v37  ;;  %1200 = vmatprep.mubr.msk.f32.mxu1 %vm1304_vm5, %v1301_v3 }
 0x3b8   :  { %1201 = vmatmul.mubr.msk.f32.vlgmr.msra.gmra.mrb[12].mxu1 %vm481_vm6, %v884_v38 }
 0x481   :  { %v627_v39 = vpop.f32.mrb[8].mxu1 }
 0x482   :  { %v631_v40 = vmax.f32 %v627_v39, 0.0  ;;  %v1182_v41 = vpop.f32.mrb[9].mxu1 }
 0x483   :  { %v551_v43 = vpop.f32.mrb[4].mxu0 }
 0x484   :  { %1184 = vmatpush3.msk.msra.mxu0 %vm100_vm0, %v631_v40  ;;  %v555_v44 = vmax.f32 %v551_v43, 0.0  ;;  %v1177_v45 = vpop.f32.mrb[5].mxu0 }
 0x485   :  { %1186 = vmatmul.mubr.msk.f32.vlgmr.msra.gmra.mrb[6].mxu0 %vm632_vm7, %v556_v42  ;;  %1188 = vmatprep.subr.mxu0 %v1301_v3 }
 0x486   :  { %1189 = vmatpush3.msk.msra.mxu0 %vm100_vm0, %v555_v44  ;;  %1190 = vmatprep.mubr.msk.f32.mxu0 %vm1304_vm5, %v1301_v3 }
 0x487   :  { %v878_v46 = vpop.f32.mrb[10].mxu1  ;;  %1203 = vmatprep.subr.mxu0 %v1301_v3 }
 0x488   :  { %v1197_v47 = vpop.f32.mrb[11].mxu1  ;;  %v882_v52 = vmax.f32 %v878_v46, 0.0 }
 0x48b   :  { %v954_v49 = vpop.f32.mrb[12].mxu1 }
 0x48c   :  { %v958_v50 = vmax.f32 %v954_v49, 0.0  ;;  %v1202_v51 = vpop.f32.mrb[13].mxu1 }
 0x48d   :  { %1191 = vmatmul.mubr.msk.f32.vlgmr.msra.gmra.mrb[6].mxu0 %vm632_vm7, %v479_v48 }
 0x48e   :  { %1204 = vmatpush3.msk.msra.mxu0 %vm100_vm0, %v958_v50  ;;  %1205 = vmatprep.mubr.msk.f32.mxu0 %vm1304_vm5, %v1301_v3 }
 0x48f   :  { %1208 = vmatprep.subr.mxu0 %v1301_v3 }
 0x491   :  { %1206 = vmatmul.mubr.msk.f32.vlgmr.msra.gmra.mrb[8].mxu0 %vm632_vm7, %v556_v42 }
 0x492   :  { %1209 = vmatpush3.msk.msra.mxu0 %vm100_vm0, %v882_v52  ;;  %1210 = vmatprep.mubr.msk.f32.mxu0 %vm1304_vm5, %v1301_v3 }
 0x499   :  { %1211 = vmatmul.mubr.msk.f32.vlgmr.msra.gmra.mrb[8].mxu0 %vm632_vm7, %v479_v48 }
 0x560   :  { %v781_v53 = vpop.f32.mrb[6].mxu0 }
 0x561   :  { %v1147_v54 = vmul.f32 -1.442695, %v781_v53  ;;  %v1192_v55 = vpop.f32.mrb[7].mxu0 }
 0x563   :  { %1293 = vpow2.f32 %v1147_v54 }
 0x56c   :  { %v1107_v56 = vpop.f32.mrb[8].mxu0 }
 0x56d   :  { %v1294_v57 = vpop.eup %1293  ;;  %v1154_v58 = vmul.f32 -1.442695, %v1107_v56  ;;  %v1212_v59 = vpop.f32.mrb[9].mxu0 }
 0x56e   :  { %v788_v60 = vadd.f32 1.0, %v1294_v57 }
 0x56f   :  { %1295 = vpow2.f32 %v1154_v58 }
 0x570   :  { %1297 = vrcp.f32 %v788_v60 }
 0x579   :  { %v1296_v61 = vpop.eup %1295 }
 0x57a   :  { %v1298_v62 = vpop.eup %1297  ;;  %v1114_v63 = vadd.f32 1.0, %v1296_v61 }
 0x57b   :  { %793 = vperm.xlu0 %1289, %v1298_v62  }
 0x57c   :  { %1299 = vrcp.f32 %v1114_v63 }
 0x586   :  { %v1300_v0 = vpop.eup %1299 }
 0x587   :  { %1119 = vperm.xlu1 %1290, %v1300_v0  }
 0x5fa   :  { %v794_v3 = vpop.permute.xlu0 %793 }
 0x5fb   :  { %v796_v1 = vmul.f32 %v794_v3, %v1555_v21  ;;  %v797_v2 = vmul.f32 %v794_v3, %v1557_v22 }
 0x5fd   :  { %798 = vst [vmem:[%s1649_s10] sm:$0xff] %v796_v1  ;;  %799 = vst [vmem:[%s1649_s10 + $0x8] sm:$0xff] %v797_v2 }
 0x606   :  { %v1120_v4 = vpop.permute.xlu1 %1119 }
 0x607   :  { %v1122_v5 = vmul.f32 %v1120_v4, %v1563_v25  ;;  %v1123_v6 = vmul.f32 %v1120_v4, %v1565_v26 }
 0x609   :  { %1155 = vst [vmem:[%s1649_s10 + $0x10] sm:$0xff] %v1122_v5  ;;  %1156 = vst [vmem:[%s1649_s10 + $0x18] sm:$0xff] %v1123_v6 }

</bundles_post_ra>
